<compile_context>
chip_gen: v5e
topology: v5e:2x2
jax: 0.10.0
libtpu: 0.0.40
codegen_flags: <defaults>
</compile_context>

<pallas_src>
import functools

import jax
import jax.numpy as jnp
from jax.experimental import pallas as pl
from jax.experimental.pallas import tpu as pltpu

BN_EPS = 1e-5


def _batchnorm(h, gamma, beta):
    """Training-mode BatchNorm1d with fused statistics (single pass over h)."""
    inv_n = 1.0 / h.shape[0]
    s1 = jnp.sum(h, axis=0, keepdims=True)
    s2 = jnp.sum(h * h, axis=0, keepdims=True)
    mu = s1 * inv_n
    var = jnp.maximum(s2 * inv_n - mu * mu, 0.0)  # guard E[x^2]-mu^2 cancellation
    return (h - mu) * (jax.lax.rsqrt(var + BN_EPS) * gamma) + beta


def actor_kernel(
    x_ref,
    w1_ref, w2_ref, w3_ref, b3_ref,
    g0_ref, be0_ref,
    g1_ref, be1_ref,
    g2_ref, be2_ref,
    o_ref,
    h1_ref, acc_ref,
):
    k = pl.program_id(0)
    nk = pl.num_programs(0)
    tk = w2_ref.shape[0]  # static chunk size of layer2's K dimension

    # -- first grid step: norm0 -> layer1 (bias dropped, BN cancels it) -> BN1 -> ReLU
    @pl.when(k == 0)
    def _():
        x = x_ref[...].astype(jnp.float32)
        h0 = _batchnorm(x, g0_ref[...], be0_ref[...])
        h1 = jnp.dot(h0.astype(jnp.bfloat16), w1_ref[...],
                     preferred_element_type=jnp.float32)
        h1 = jnp.maximum(_batchnorm(h1, g1_ref[...], be1_ref[...]), 0.0)
        h1_ref[...] = h1.astype(jnp.bfloat16)
        acc_ref[...] = jnp.zeros_like(acc_ref)

    # -- every step: accumulate layer2 partial product for this K chunk
    start = pl.multiple_of(k * tk, tk)
    lhs = h1_ref[:, pl.ds(start, tk)]
    acc_ref[...] += jnp.dot(lhs, w2_ref[...], preferred_element_type=jnp.float32)

    # -- last step: BN2 (cancels dropped b2) -> ReLU -> layer3 + b3 -> tanh -> store
    @pl.when(k == nk - 1)
    def _():
        h2 = jnp.maximum(_batchnorm(acc_ref[...], g2_ref[...], be2_ref[...]), 0.0)
        h3 = jnp.dot(h2.astype(jnp.bfloat16), w3_ref[...],
                     preferred_element_type=jnp.float32) + b3_ref[...]
        o_ref[...] = jnp.tanh(h3).astype(o_ref.dtype)


@functools.partial(jax.jit, static_argnames=("tk",))
def actor_forward(state, params, *, tk=256):
    """state: (B, state_space) float32. params: dict (see init_actor_params)."""
    if state.ndim == 1:
        state = state[None, :]
    B, S = state.shape
    if B < 2:
        # PyTorch BatchNorm1d raises in training mode with batch size 1;
        # match that instead of silently collapsing the output to beta.
        raise ValueError("Actor forward requires batch size >= 2 (training-mode BatchNorm).")

    H1 = params["w1"].shape[1]
    H2 = params["w2"].shape[1]
    A = params["w3"].shape[1]

    tk = min(tk, H1)
    assert H1 % tk == 0, "hidden_layer1 must be divisible by tk"
    nk = H1 // tk

    # bf16 weights: MXU-native on v5e/v6e/v7x, halves weight DMA.
    w1 = params["w1"].astype(jnp.bfloat16)
    w2 = params["w2"].astype(jnp.bfloat16)
    w3 = params["w3"].astype(jnp.bfloat16)
    b3 = params["b3"]
    # b1/b2 intentionally NOT passed: exactly cancelled by BN1/BN2 mean subtraction.

    args = (
        state,
        w1, w2, w3, b3,
        params["g0"], params["be0"],
        params["g1"], params["be1"],
        params["g2"], params["be2"],
    )

    in_specs = [
        pl.BlockSpec((B, S), lambda k: (0, 0)),      # x (resident)
        pl.BlockSpec((S, H1), lambda k: (0, 0)),     # w1 (resident)
        pl.BlockSpec((tk, H2), lambda k: (k, 0)),    # w2 chunk (pipelined over k)
        pl.BlockSpec((H2, A), lambda k: (0, 0)),     # w3
        pl.BlockSpec((1, A), lambda k: (0, 0)),      # b3
        pl.BlockSpec((1, S), lambda k: (0, 0)),      # g0
        pl.BlockSpec((1, S), lambda k: (0, 0)),      # be0
        pl.BlockSpec((1, H1), lambda k: (0, 0)),     # g1
        pl.BlockSpec((1, H1), lambda k: (0, 0)),     # be1
        pl.BlockSpec((1, H2), lambda k: (0, 0)),     # g2
        pl.BlockSpec((1, H2), lambda k: (0, 0)),     # be2
    ]
    out_specs = pl.BlockSpec((B, A), lambda k: (0, 0))

    scratch_shapes = [
        pltpu.VMEM((B, H1), jnp.bfloat16),   # post-BN1/ReLU activations (matmul LHS)
        pltpu.VMEM((B, H2), jnp.float32),    # layer2 f32 accumulator
    ]

    flops = 2 * B * (S * H1 + H1 * H2 + H2 * A)
    bytes_accessed = (
        B * S * 4                       # state in
        + (S * H1 + H1 * H2 + H2 * A) * 2   # bf16 weights
        + (2 * S + 2 * H1 + 2 * H2 + A) * 4  # BN affine params + b3
        + B * A * 4                     # output
    )
    transcendentals = B * A + B * (S + H1 + H2)  # tanh + BN rsqrt

    return pl.pallas_call(
        actor_kernel,
        out_shape=jax.ShapeDtypeStruct((B, A), jnp.float32),
        grid_spec=pltpu.PrefetchScalarGridSpec(
            num_scalar_prefetch=0,
            grid=(nk,),
            in_specs=in_specs,
            out_specs=out_specs,
            scratch_shapes=scratch_shapes,
        ),
        compiler_params=pltpu.CompilerParams(
            dimension_semantics=("arbitrary",),   # K reduction axis, output resident
        ),
        cost_estimate=pl.CostEstimate(
            flops=int(flops),
            transcendentals=int(transcendentals),
            bytes_accessed=int(bytes_accessed),
        ),
    )(*args)


def init_actor_params(key, state_space, action_space,
                      hidden_layer1=512, hidden_layer2=256):
    """Mirrors Actor.reset_parameters(): layer1/layer2 weights ~ U(-1/sqrt(out), 1/sqrt(out)),
       layer3 ~ U(-0.3, 0.3); biases ~ U(-1/sqrt(in), 1/sqrt(in)) (PyTorch Linear default);
       BatchNorm gamma=1, beta=0. Linear weights stored pre-transposed as (in, out), f32."""
    ks = jax.random.split(key, 6)

    def u(k, shape, lim):
        return jax.random.uniform(k, shape, jnp.float32, -lim, lim)

    lim1 = 1.0 / jnp.sqrt(float(hidden_layer1))
    lim2 = 1.0 / jnp.sqrt(float(hidden_layer2))

    return {
        "w1": u(ks[0], (state_space, hidden_layer1), lim1),
        "b1": u(ks[1], (1, hidden_layer1), 1.0 / jnp.sqrt(float(state_space))),
        "w2": u(ks[2], (hidden_layer1, hidden_layer2), lim2),
        "b2": u(ks[3], (1, hidden_layer2), 1.0 / jnp.sqrt(float(hidden_layer1))),
        "w3": u(ks[4], (hidden_layer2, action_space), 0.3),
        "b3": u(ks[5], (1, action_space), 1.0 / jnp.sqrt(float(hidden_layer2))),
        "g0": jnp.ones((1, state_space), jnp.float32),
        "be0": jnp.zeros((1, state_space), jnp.float32),
        "g1": jnp.ones((1, hidden_layer1), jnp.float32),
        "be1": jnp.zeros((1, hidden_layer1), jnp.float32),
        "g2": jnp.ones((1, hidden_layer2), jnp.float32),
        "be2": jnp.zeros((1, hidden_layer2), jnp.float32),
    }


def actor_reference(state, params):
    """Pure-JAX f32 reference of the PyTorch module's forward pass (with b1/b2)."""
    if state.ndim == 1:
        state = state[None, :]

    def bn(h, g, b):
        mu = jnp.mean(h, axis=0, keepdims=True)
        var = jnp.mean((h - mu) ** 2, axis=0, keepdims=True)
        return (h - mu) * jax.lax.rsqrt(var + BN_EPS) * g + b

    h0 = bn(state, params["g0"], params["be0"])
    h1 = jnp.maximum(bn(h0 @ params["w1"] + params["b1"],
                        params["g1"], params["be1"]), 0.0)
    h2 = jnp.maximum(bn(h1 @ params["w2"] + params["b2"],
                        params["g2"], params["be2"]), 0.0)
    return jnp.tanh(h2 @ params["w3"] + params["b3"])


if __name__ == "__main__":
    key = jax.random.PRNGKey(0)
    k_params, k_state = jax.random.split(key)

    batch = 8
    state_space = 16
    action_space = 4
    hidden1, hidden2 = 512, 256

    params = init_actor_params(k_params, state_space, action_space, hidden1, hidden2)
    state = jax.random.normal(k_state, (batch, state_space), jnp.float32)

    out = jax.block_until_ready(actor_forward(state, params))
    ref = actor_reference(state, params)

    assert out.shape == (batch, action_space)
    # Loose tolerance accounts for bf16 weights / activations on the matmul path.
    assert jnp.allclose(out, ref, atol=5e-2, rtol=5e-2), "mismatch vs f32 reference"

    print("KERNEL_OK")
</pallas_src>

<mosaic_0001>
module attributes {stable_mosaic.version = 11 : i64} {
  func.func @actor_kernel(%arg0: i32, %arg1: memref<8x16xf32, #tpu.memory_space<vmem>>, %arg2: memref<16x512xbf16, #tpu.memory_space<vmem>>, %arg3: memref<256x256xbf16, #tpu.memory_space<vmem>>, %arg4: memref<256x4xbf16, #tpu.memory_space<vmem>>, %arg5: memref<1x4xf32, #tpu.memory_space<vmem>>, %arg6: memref<1x16xf32, #tpu.memory_space<vmem>>, %arg7: memref<1x16xf32, #tpu.memory_space<vmem>>, %arg8: memref<1x512xf32, #tpu.memory_space<vmem>>, %arg9: memref<1x512xf32, #tpu.memory_space<vmem>>, %arg10: memref<1x256xf32, #tpu.memory_space<vmem>>, %arg11: memref<1x256xf32, #tpu.memory_space<vmem>>, %arg12: memref<8x4xf32, #tpu.memory_space<vmem>>, %arg13: memref<8x512xbf16, #tpu.memory_space<vmem>>, %arg14: memref<8x256xf32, #tpu.memory_space<vmem>>) attributes {dimension_semantics = [#tpu.dimension_semantics<arbitrary>], iteration_bounds = array<i64: 2>, scalar_prefetch = 0 : i64, scratch_operands = 2 : i64, tpu.core_type = #tpu.core_type<tc>, window_params = [{pipeline_mode = #tpu.pipeline_mode<synchronous>, transform_indices = @transform_0, window_bounds = array<i64: 8, 16>}, {pipeline_mode = #tpu.pipeline_mode<synchronous>, transform_indices = @transform_1, window_bounds = array<i64: 16, 512>}, {transform_indices = @transform_2, window_bounds = array<i64: 256, 256>}, {pipeline_mode = #tpu.pipeline_mode<synchronous>, transform_indices = @transform_3, window_bounds = array<i64: 256, 4>}, {pipeline_mode = #tpu.pipeline_mode<synchronous>, transform_indices = @transform_4, window_bounds = array<i64: 1, 4>}, {pipeline_mode = #tpu.pipeline_mode<synchronous>, transform_indices = @transform_5, window_bounds = array<i64: 1, 16>}, {pipeline_mode = #tpu.pipeline_mode<synchronous>, transform_indices = @transform_6, window_bounds = array<i64: 1, 16>}, {pipeline_mode = #tpu.pipeline_mode<synchronous>, transform_indices = @transform_7, window_bounds = array<i64: 1, 512>}, {pipeline_mode = #tpu.pipeline_mode<synchronous>, transform_indices = @transform_8, window_bounds = array<i64: 1, 512>}, {pipeline_mode = #tpu.pipeline_mode<synchronous>, transform_indices = @transform_9, window_bounds = array<i64: 1, 256>}, {pipeline_mode = #tpu.pipeline_mode<synchronous>, transform_indices = @transform_10, window_bounds = array<i64: 1, 256>}, {pipeline_mode = #tpu.pipeline_mode<synchronous>, transform_indices = @transform_11, window_bounds = array<i64: 8, 4>}]} {
    %c0_i32 = arith.constant 0 : i32
    %0 = arith.cmpi eq, %arg0, %c0_i32 : i32
    %1 = arith.extui %0 : i1 to i32
    %c0_i32_0 = arith.constant 0 : i32
    %2 = arith.cmpi ne, %1, %c0_i32_0 : i32
    scf.if %2 {
      %c0_8 = arith.constant 0 : index
      %c0_9 = arith.constant 0 : index
      %15 = vector.load %arg1[%c0_8, %c0_9] : memref<8x16xf32, #tpu.memory_space<vmem>>, vector<8x16xf32>
      %c0_10 = arith.constant 0 : index
      %c0_11 = arith.constant 0 : index
      %16 = vector.load %arg6[%c0_10, %c0_11] : memref<1x16xf32, #tpu.memory_space<vmem>>, vector<1x16xf32>
      %c0_12 = arith.constant 0 : index
      %c0_13 = arith.constant 0 : index
      %17 = vector.load %arg7[%c0_12, %c0_13] : memref<1x16xf32, #tpu.memory_space<vmem>>, vector<1x16xf32>
      %cst_14 = arith.constant dense<0.000000e+00> : vector<16xf32>
      %18 = vector.multi_reduction <add>, %15, %cst_14 [0] : vector<8x16xf32> to vector<16xf32>
      %19 = vector.shape_cast %18 : vector<16xf32> to vector<1x16xf32>
      %20 = arith.mulf %15, %15 : vector<8x16xf32>
      %cst_15 = arith.constant dense<0.000000e+00> : vector<16xf32>
      %21 = vector.multi_reduction <add>, %20, %cst_15 [0] : vector<8x16xf32> to vector<16xf32>
      %22 = vector.shape_cast %21 : vector<16xf32> to vector<1x16xf32>
      %cst_16 = arith.constant 1.250000e-01 : f32
      %23 = vector.broadcast %cst_16 : f32 to vector<1x16xf32>
      %24 = arith.mulf %19, %23 : vector<1x16xf32>
      %cst_17 = arith.constant 1.250000e-01 : f32
      %25 = vector.broadcast %cst_17 : f32 to vector<1x16xf32>
      %26 = arith.mulf %22, %25 : vector<1x16xf32>
      %27 = arith.mulf %24, %24 : vector<1x16xf32>
      %28 = arith.subf %26, %27 : vector<1x16xf32>
      %cst_18 = arith.constant 0.000000e+00 : f32
      %29 = vector.broadcast %cst_18 : f32 to vector<1x16xf32>
      %30 = arith.maximumf %28, %29 : vector<1x16xf32>
      %31 = vector.broadcast %24 : vector<1x16xf32> to vector<8x16xf32>
      %32 = arith.subf %15, %31 : vector<8x16xf32>
      %cst_19 = arith.constant 9.99999974E-6 : f32
      %33 = vector.broadcast %cst_19 : f32 to vector<1x16xf32>
      %34 = arith.addf %30, %33 : vector<1x16xf32>
      %35 = math.rsqrt %34 : vector<1x16xf32>
      %36 = arith.mulf %35, %16 : vector<1x16xf32>
      %37 = vector.broadcast %36 : vector<1x16xf32> to vector<8x16xf32>
      %38 = arith.mulf %32, %37 : vector<8x16xf32>
      %39 = vector.broadcast %17 : vector<1x16xf32> to vector<8x16xf32>
      %40 = arith.addf %38, %39 : vector<8x16xf32>
      %41 = arith.truncf %40 : vector<8x16xf32> to vector<8x16xbf16>
      %c0_20 = arith.constant 0 : index
      %c0_21 = arith.constant 0 : index
      %42 = vector.load %arg2[%c0_20, %c0_21] : memref<16x512xbf16, #tpu.memory_space<vmem>>, vector<16x512xbf16>
      %cst_22 = arith.constant dense<0.000000e+00> : vector<8x512xf32>
      %43 = tpu.matmul %41, %42, %cst_22 {dimension_numbers = #tpu.dot_dimension_numbers<[1], [0], [0], [1], [0, 0, 1, 1], [], []>} : vector<8x16xbf16>, vector<16x512xbf16>, vector<8x512xf32> -> vector<8x512xf32>
      %c0_23 = arith.constant 0 : index
      %c0_24 = arith.constant 0 : index
      %44 = vector.load %arg8[%c0_23, %c0_24] : memref<1x512xf32, #tpu.memory_space<vmem>>, vector<1x512xf32>
      %c0_25 = arith.constant 0 : index
      %c0_26 = arith.constant 0 : index
      %45 = vector.load %arg9[%c0_25, %c0_26] : memref<1x512xf32, #tpu.memory_space<vmem>>, vector<1x512xf32>
      %cst_27 = arith.constant dense<0.000000e+00> : vector<512xf32>
      %46 = vector.multi_reduction <add>, %43, %cst_27 [0] : vector<8x512xf32> to vector<512xf32>
      %47 = vector.shape_cast %46 : vector<512xf32> to vector<1x512xf32>
      %48 = arith.mulf %43, %43 : vector<8x512xf32>
      %cst_28 = arith.constant dense<0.000000e+00> : vector<512xf32>
      %49 = vector.multi_reduction <add>, %48, %cst_28 [0] : vector<8x512xf32> to vector<512xf32>
      %50 = vector.shape_cast %49 : vector<512xf32> to vector<1x512xf32>
      %cst_29 = arith.constant 1.250000e-01 : f32
      %51 = vector.broadcast %cst_29 : f32 to vector<1x512xf32>
      %52 = arith.mulf %47, %51 : vector<1x512xf32>
      %cst_30 = arith.constant 1.250000e-01 : f32
      %53 = vector.broadcast %cst_30 : f32 to vector<1x512xf32>
      %54 = arith.mulf %50, %53 : vector<1x512xf32>
      %55 = arith.mulf %52, %52 : vector<1x512xf32>
      %56 = arith.subf %54, %55 : vector<1x512xf32>
      %cst_31 = arith.constant 0.000000e+00 : f32
      %57 = vector.broadcast %cst_31 : f32 to vector<1x512xf32>
      %58 = arith.maximumf %56, %57 : vector<1x512xf32>
      %59 = vector.broadcast %52 : vector<1x512xf32> to vector<8x512xf32>
      %60 = arith.subf %43, %59 : vector<8x512xf32>
      %cst_32 = arith.constant 9.99999974E-6 : f32
      %61 = vector.broadcast %cst_32 : f32 to vector<1x512xf32>
      %62 = arith.addf %58, %61 : vector<1x512xf32>
      %63 = math.rsqrt %62 : vector<1x512xf32>
      %64 = arith.mulf %63, %44 : vector<1x512xf32>
      %65 = vector.broadcast %64 : vector<1x512xf32> to vector<8x512xf32>
      %66 = arith.mulf %60, %65 : vector<8x512xf32>
      %67 = vector.broadcast %45 : vector<1x512xf32> to vector<8x512xf32>
      %68 = arith.addf %66, %67 : vector<8x512xf32>
      %cst_33 = arith.constant 0.000000e+00 : f32
      %69 = vector.broadcast %cst_33 : f32 to vector<8x512xf32>
      %70 = arith.maximumf %68, %69 : vector<8x512xf32>
      %71 = arith.truncf %70 : vector<8x512xf32> to vector<8x512xbf16>
      %c0_34 = arith.constant 0 : index
      %c0_35 = arith.constant 0 : index
      %72 = vector.load %arg13[%c0_34, %c0_35] : memref<8x512xbf16, #tpu.memory_space<vmem>>, vector<8x512xbf16>
      tpu.vector_store %arg13[%c0_34, %c0_35], %71 {strides = array<i32>} : memref<8x512xbf16, #tpu.memory_space<vmem>>, vector<8x512xbf16>,
      %cst_36 = arith.constant 0.000000e+00 : f32
      %73 = vector.broadcast %cst_36 : f32 to vector<8x256xf32>
      %c0_37 = arith.constant 0 : index
      %c0_38 = arith.constant 0 : index
      %74 = vector.load %arg14[%c0_37, %c0_38] : memref<8x256xf32, #tpu.memory_space<vmem>>, vector<8x256xf32>
      tpu.vector_store %arg14[%c0_37, %c0_38], %73 {strides = array<i32>} : memref<8x256xf32, #tpu.memory_space<vmem>>, vector<8x256xf32>,
    } else {
    }
    %c256_i32 = arith.constant 256 : i32
    %3 = arith.muli %arg0, %c256_i32 : i32
    %4 = tpu.assume_multiple %3, 256 : i32
    %c0 = arith.constant 0 : index
    %5 = arith.index_cast %4 : i32 to index
    %6 = vector.load %arg13[%c0, %5] : memref<8x512xbf16, #tpu.memory_space<vmem>>, vector<8x256xbf16>
    %c0_1 = arith.constant 0 : index
    %c0_2 = arith.constant 0 : index
    %7 = vector.load %arg14[%c0_1, %c0_2] : memref<8x256xf32, #tpu.memory_space<vmem>>, vector<8x256xf32>
    %c0_3 = arith.constant 0 : index
    %c0_4 = arith.constant 0 : index
    %8 = vector.load %arg3[%c0_3, %c0_4] : memref<256x256xbf16, #tpu.memory_space<vmem>>, vector<256x256xbf16>
    %cst = arith.constant dense<0.000000e+00> : vector<8x256xf32>
    %9 = tpu.matmul %6, %8, %cst {dimension_numbers = #tpu.dot_dimension_numbers<[1], [0], [0], [1], [0, 0, 1, 1], [], []>} : vector<8x256xbf16>, vector<256x256xbf16>, vector<8x256xf32> -> vector<8x256xf32>
    %10 = arith.addf %7, %9 : vector<8x256xf32>
    %c0_5 = arith.constant 0 : index
    %c0_6 = arith.constant 0 : index
    %11 = vector.load %arg14[%c0_5, %c0_6] : memref<8x256xf32, #tpu.memory_space<vmem>>, vector<8x256xf32>
    tpu.vector_store %arg14[%c0_5, %c0_6], %10 {strides = array<i32>} : memref<8x256xf32, #tpu.memory_space<vmem>>, vector<8x256xf32>,
    %c1_i32 = arith.constant 1 : i32
    %12 = arith.cmpi eq, %arg0, %c1_i32 : i32
    %13 = arith.extui %12 : i1 to i32
    %c0_i32_7 = arith.constant 0 : i32
    %14 = arith.cmpi ne, %13, %c0_i32_7 : i32
    scf.if %14 {
      %c0_8 = arith.constant 0 : index
      %c0_9 = arith.constant 0 : index
      %15 = vector.load %arg14[%c0_8, %c0_9] : memref<8x256xf32, #tpu.memory_space<vmem>>, vector<8x256xf32>
      %c0_10 = arith.constant 0 : index
      %c0_11 = arith.constant 0 : index
      %16 = vector.load %arg10[%c0_10, %c0_11] : memref<1x256xf32, #tpu.memory_space<vmem>>, vector<1x256xf32>
      %c0_12 = arith.constant 0 : index
      %c0_13 = arith.constant 0 : index
      %17 = vector.load %arg11[%c0_12, %c0_13] : memref<1x256xf32, #tpu.memory_space<vmem>>, vector<1x256xf32>
      %cst_14 = arith.constant dense<0.000000e+00> : vector<256xf32>
      %18 = vector.multi_reduction <add>, %15, %cst_14 [0] : vector<8x256xf32> to vector<256xf32>
      %19 = vector.shape_cast %18 : vector<256xf32> to vector<1x256xf32>
      %20 = arith.mulf %15, %15 : vector<8x256xf32>
      %cst_15 = arith.constant dense<0.000000e+00> : vector<256xf32>
      %21 = vector.multi_reduction <add>, %20, %cst_15 [0] : vector<8x256xf32> to vector<256xf32>
      %22 = vector.shape_cast %21 : vector<256xf32> to vector<1x256xf32>
      %cst_16 = arith.constant 1.250000e-01 : f32
      %23 = vector.broadcast %cst_16 : f32 to vector<1x256xf32>
      %24 = arith.mulf %19, %23 : vector<1x256xf32>
      %cst_17 = arith.constant 1.250000e-01 : f32
      %25 = vector.broadcast %cst_17 : f32 to vector<1x256xf32>
      %26 = arith.mulf %22, %25 : vector<1x256xf32>
      %27 = arith.mulf %24, %24 : vector<1x256xf32>
      %28 = arith.subf %26, %27 : vector<1x256xf32>
      %cst_18 = arith.constant 0.000000e+00 : f32
      %29 = vector.broadcast %cst_18 : f32 to vector<1x256xf32>
      %30 = arith.maximumf %28, %29 : vector<1x256xf32>
      %31 = vector.broadcast %24 : vector<1x256xf32> to vector<8x256xf32>
      %32 = arith.subf %15, %31 : vector<8x256xf32>
      %cst_19 = arith.constant 9.99999974E-6 : f32
      %33 = vector.broadcast %cst_19 : f32 to vector<1x256xf32>
      %34 = arith.addf %30, %33 : vector<1x256xf32>
      %35 = math.rsqrt %34 : vector<1x256xf32>
      %36 = arith.mulf %35, %16 : vector<1x256xf32>
      %37 = vector.broadcast %36 : vector<1x256xf32> to vector<8x256xf32>
      %38 = arith.mulf %32, %37 : vector<8x256xf32>
      %39 = vector.broadcast %17 : vector<1x256xf32> to vector<8x256xf32>
      %40 = arith.addf %38, %39 : vector<8x256xf32>
      %cst_20 = arith.constant 0.000000e+00 : f32
      %41 = vector.broadcast %cst_20 : f32 to vector<8x256xf32>
      %42 = arith.maximumf %40, %41 : vector<8x256xf32>
      %43 = arith.truncf %42 : vector<8x256xf32> to vector<8x256xbf16>
      %c0_21 = arith.constant 0 : index
      %c0_22 = arith.constant 0 : index
      %44 = vector.load %arg4[%c0_21, %c0_22] : memref<256x4xbf16, #tpu.memory_space<vmem>>, vector<256x4xbf16>
      %cst_23 = arith.constant dense<0.000000e+00> : vector<8x4xf32>
      %45 = tpu.matmul %43, %44, %cst_23 {dimension_numbers = #tpu.dot_dimension_numbers<[1], [0], [0], [1], [0, 0, 1, 1], [], []>} : vector<8x256xbf16>, vector<256x4xbf16>, vector<8x4xf32> -> vector<8x4xf32>
      %c0_24 = arith.constant 0 : index
      %c0_25 = arith.constant 0 : index
      %46 = vector.load %arg5[%c0_24, %c0_25] : memref<1x4xf32, #tpu.memory_space<vmem>>, vector<1x4xf32>
      %47 = vector.broadcast %46 : vector<1x4xf32> to vector<8x4xf32>
      %48 = arith.addf %45, %47 : vector<8x4xf32>
      %49 = math.tanh %48 : vector<8x4xf32>
      %c0_26 = arith.constant 0 : index
      %c0_27 = arith.constant 0 : index
      %50 = vector.load %arg12[%c0_26, %c0_27] : memref<8x4xf32, #tpu.memory_space<vmem>>, vector<8x4xf32>
      tpu.vector_store %arg12[%c0_26, %c0_27], %49 {strides = array<i32>} : memref<8x4xf32, #tpu.memory_space<vmem>>, vector<8x4xf32>,
    } else {
    }
    return
  }
  func.func @transform_0(%arg0: i32) -> (i32, i32) {
    %c0_i32 = arith.constant 0 : i32
    %c0_i32_0 = arith.constant 0 : i32
    %c0_i32_1 = arith.constant 0 : i32
    return %c0_i32, %c0_i32_0 : i32, i32
  }
  func.func @transform_1(%arg0: i32) -> (i32, i32) {
    %c0_i32 = arith.constant 0 : i32
    %c0_i32_0 = arith.constant 0 : i32
    %c0_i32_1 = arith.constant 0 : i32
    return %c0_i32, %c0_i32_0 : i32, i32
  }
  func.func @transform_2(%arg0: i32) -> (i32, i32) {
    %c0_i32 = arith.constant 0 : i32
    %c0_i32_0 = arith.constant 0 : i32
    return %arg0, %c0_i32 : i32, i32
  }
  func.func @transform_3(%arg0: i32) -> (i32, i32) {
    %c0_i32 = arith.constant 0 : i32
    %c0_i32_0 = arith.constant 0 : i32
    %c0_i32_1 = arith.constant 0 : i32
    return %c0_i32, %c0_i32_0 : i32, i32
  }
  func.func @transform_4(%arg0: i32) -> (i32, i32) {
    %c0_i32 = arith.constant 0 : i32
    %c0_i32_0 = arith.constant 0 : i32
    %c0_i32_1 = arith.constant 0 : i32
    return %c0_i32, %c0_i32_0 : i32, i32
  }
  func.func @transform_5(%arg0: i32) -> (i32, i32) {
    %c0_i32 = arith.constant 0 : i32
    %c0_i32_0 = arith.constant 0 : i32
    %c0_i32_1 = arith.constant 0 : i32
    return %c0_i32, %c0_i32_0 : i32, i32
  }
  func.func @transform_6(%arg0: i32) -> (i32, i32) {
    %c0_i32 = arith.constant 0 : i32
    %c0_i32_0 = arith.constant 0 : i32
    %c0_i32_1 = arith.constant 0 : i32
    return %c0_i32, %c0_i32_0 : i32, i32
  }
  func.func @transform_7(%arg0: i32) -> (i32, i32) {
    %c0_i32 = arith.constant 0 : i32
    %c0_i32_0 = arith.constant 0 : i32
    %c0_i32_1 = arith.constant 0 : i32
    return %c0_i32, %c0_i32_0 : i32, i32
  }
  func.func @transform_8(%arg0: i32) -> (i32, i32) {
    %c0_i32 = arith.constant 0 : i32
    %c0_i32_0 = arith.constant 0 : i32
    %c0_i32_1 = arith.constant 0 : i32
    return %c0_i32, %c0_i32_0 : i32, i32
  }
  func.func @transform_9(%arg0: i32) -> (i32, i32) {
    %c0_i32 = arith.constant 0 : i32
    %c0_i32_0 = arith.constant 0 : i32
    %c0_i32_1 = arith.constant 0 : i32
    return %c0_i32, %c0_i32_0 : i32, i32
  }
  func.func @transform_10(%arg0: i32) -> (i32, i32) {
    %c0_i32 = arith.constant 0 : i32
    %c0_i32_0 = arith.constant 0 : i32
    %c0_i32_1 = arith.constant 0 : i32
    return %c0_i32, %c0_i32_0 : i32, i32
  }
  func.func @transform_11(%arg0: i32) -> (i32, i32) {
    %c0_i32 = arith.constant 0 : i32
    %c0_i32_0 = arith.constant 0 : i32
    %c0_i32_1 = arith.constant 0 : i32
    return %c0_i32, %c0_i32_0 : i32, i32
  }
}

</mosaic_0001>

<bundles_post_ra>
// kernel: actor_forward.1
= control target key start
LH: loop header
LB: loop body
LE: loop exit
PB: predicated region body
PF: predicated region fallthrough
CT: control target
= control target key end

     0   :  { %s1589_s17 = smov 0   ;;  %s1848_s0 = inlined_call_operand.vmem [shape: f32[8,16], index: 0, kind: input, shape index: {}]   ;;  %s1849_s1 = inlined_call_operand.vmem [shape: bf16[16,512], index: 1, kind: input, shape index: {}]   ;;  %s1850_s2 = inlined_call_operand.vmem [shape: bf16[512,256], index: 2, kind: input, shape index: {}]   ;;  %s1851_s3 = inlined_call_operand.vmem [shape: bf16[256,4], index: 3, kind: input, shape index: {}]   ;;  %s1852_s4 = inlined_call_operand.vmem [shape: f32[1,4], index: 4, kind: input, shape index: {}]   ;;  %s1853_s5 = inlined_call_operand.vmem [shape: f32[1,16], index: 5, kind: input, shape index: {}]   ;;  %s1854_s6 = inlined_call_operand.vmem [shape: f32[1,16], index: 6, kind: input, shape index: {}]   ;;  %s1855_s7 = inlined_call_operand.vmem [shape: f32[1,512], index: 7, kind: input, shape index: {}]   ;;  %s1856_s8 = inlined_call_operand.vmem [shape: f32[1,512], index: 8, kind: input, shape index: {}]   ;;  %s1857_s9 = inlined_call_operand.vmem [shape: f32[1,256], index: 9, kind: input, shape index: {}]   ;;  %s1858_s10 = inlined_call_operand.vmem [shape: f32[1,256], index: 10, kind: input, shape index: {}]   ;;  %s1859_s11 = inlined_call_operand.vmem [shape: f32[8,4], index: 11, kind: output, shape index: {}]  }
   0x1 LB: > { %s1595_s18 = sadd.s32 4294967295, %s1526_s17   ;;  %p1218_p0 = scmp.ge.s32.totalorder %s1526_s17, 1  ;;  %s1526_s17 = sphi %s1589_s17, %s21_s17  }
   0x2   : > { %p334_p1 = scmp.lt.s32.totalorder %s1526_s17, 3 }
   0x4   : > { %p335_p2 = pnand %p1218_p0, %p334_p1 }
   0x5   : > { %s1219_s19 = sshll.u32 (!%p335_p2), %s1595_s18, 5  ;;  %p1222_p4 = scmp.ne.s32.totalorder (!%p335_p2), %s1595_s18, 0 }
   0x6   : > { %338 = sbr.rel (%p335_p2) target bundleno = 626 (0x272), region = 64  ;;  %p371_p3 = scmp.lt.s32.totalorder (!%p335_p2), %s1219_s19, 63 }
   0xb   : > { %s1861_s19 = smov (!%p371_p3, %s1219_s19), 63  ;;  %381 = sbr.rel (%p1222_p4) target bundleno = 257 (0x101), region = 68 }
   0xc   : > { %s1440_s20 = sshll.u32 %s1861_s19, 3 }
   0xd   : > { %s1603_s23 = scalar_lea.vmem %s1850_s2, %s1440_s20 }
  0x10   : > { %v1225_v0 = vld [vmem:[%s1849_s1] sm:$0xf]  ;;  %v1443_v1 = vld [vmem:[%s1849_s1 + $0xc] sm:$0xf0]  ;;  %v1441_v2 = vld [vmem:[%s1849_s1 + $0x4] sm:$0xf] }
  0x11   : > { %v1226_v3 = vor.u32 %v1443_v1, %v1225_v0  ;;  %v1227_v4 = vld [vmem:[%s1849_s1 + $0x10] sm:$0xf0]  ;;  %v1233_v5 = vld [vmem:[%s1849_s1 + $0x8] sm:$0xf]  ;;  %v1444_v6 = vld [vmem:[%s1849_s1 + $0x14] sm:$0xf0] }
  0x12   : > { %v1230_v7 = vor.u32 %v1441_v2, %v1227_v4  ;;  %v1234_v8 = vor.u32 %v1444_v6, %v1233_v5  ;;  %v1442_v9 = vld [vmem:[%s1849_s1 + $0xc] sm:$0xf]  ;;  %v1235_v10 = vld [vmem:[%s1849_s1 + $0x18] sm:$0xf0]  ;;  %v382_v11 = vld [vmem:[%s1848_s0] sm:$0xff]  ;;  %vm385_vm0 = vcmask 130048  }
  0x13   : > { %460 = vmatpush.bf16.msra.mxu0 %v1226_v3  ;;  %v1238_v12 = vor.u32 %v1442_v9, %v1235_v10  ;;  %v386_v13 = vsel %vm385_vm0, %v382_v11, 0.0  ;;  %v393_v14 = vmul.f32 %v382_v11, %v382_v11  ;;  %v383_v39 = vld [vmem:[%s1853_s5] sm:$0x1] }
  0x14   : > { %473 = vmatpush.bf16.msra.mxu1 %v1230_v7  ;;  %486 = vmatpush.bf16.msra.mxu2 %v1234_v8  ;;  %v387_v15 = vrot.slane %v386_v13, 4  ;;  %v1502_v45 = vld [vmem:[%s1854_s6] ss:$0 sm:$0xff] }
  0x15   : > { %499 = vmatpush.bf16.msra.mxu3 %v1238_v12  ;;  %v394_v16 = vsel %vm385_vm0, %v393_v14, 0.0 }
  0x16   : > { %v388_v17 = vadd.f32 %v387_v15, %v386_v13  ;;  %v395_v18 = vrot.slane %v394_v16, 4 }
  0x18   : > { %v389_v19 = vrot.slane %v388_v17, 2  ;;  %v396_v20 = vadd.f32 %v395_v18, %v394_v16 }
  0x1a   : > { %v390_v21 = vadd.f32 %v389_v19, %v388_v17  ;;  %v397_v22 = vrot.slane %v396_v20, 2 }
  0x1c   : > { %v391_v23 = vrot.slane %v390_v21, 1  ;;  %v398_v24 = vadd.f32 %v397_v22, %v396_v20 }
  0x1e   : > { %v392_v25 = vadd.f32 %v391_v23, %v390_v21  ;;  %v399_v26 = vrot.slane %v398_v24, 1 }
  0x20   : > { %v400_v27 = vadd.f32 %v399_v26, %v398_v24  ;;  %v401_v28 = vmul.f32 0.125, %v392_v25 }
  0x22   : > { %v402_v29 = vmul.f32 0.125, %v400_v27  ;;  %v403_v30 = vmul.f32 %v401_v28, %v401_v28  ;;  %v406_v42 = vsub.f32 %v382_v11, %v401_v28 }
  0x24   : > { %v404_v31 = vsub.f32 %v402_v29, %v403_v30 }
  0x26   : > { %v405_v32 = vmax.f32 %v404_v31, 0.0 }
  0x28   : > { %v407_v33 = vadd.f32 1e-05, %v405_v32 }
  0x2a   : > { %1503 = vrsqrt.f32 %v407_v33  ;;  %vm414_vm1 = vweird.f32 %v407_v33 }
  0x30   : > { %v1504_v34 = vpop.eup %1503 }
  0x31   : > { %v409_v35 = vmul.f32 %v1504_v34, %v407_v33  ;;  %vm415_vm2 = vweird.f32 %v1504_v34 }
  0x32   : > { %vm416_vm3 = vmor %vm414_vm1, %vm415_vm2 }
  0x33   : > { %v410_v36 = vmul.f32 %v1504_v34, %v409_v35 }
  0x35   : > { %v411_v37 = vmul.f32 0.5, %v410_v36 }
  0x37   : > { %v412_v38 = vsub.f32 1.5, %v411_v37 }
  0x39   : > { %v413_v40 = vmul.f32 %v1504_v34, %v412_v38 }
  0x3b   : > { %v417_v41 = vsel %vm416_vm3, %v1504_v34, %v413_v40 }
  0x3c   : > { %v418_v43 = vmul.f32 %v417_v41, %v383_v39 }
  0x3e   : > { %v419_v44 = vperm.slane %v418_v43, 0 }
  0x40   : > { %v420_v46 = vmul.f32 %v419_v44, %v406_v42 }
  0x42   : > { %v424_v47 = vadd.f32 %v1502_v45, %v420_v46 }
  0x44   : > { %v425_v48 = vpack.c.bf16 %v424_v47, %v424_v47 }
  0x46   : > { %1239 = vmatmul.msk.bf16.vlgmr.msra.gmra.mxu0 %vm385_vm0, %v425_v48  ;;  %1240 = vmatmul.msk.bf16.vlgmr.msra.gmra.mxu1 %vm385_vm0, %v425_v48 }
  0x47   : > { %1241 = vmatmul.msk.bf16.vlgmr.msra.gmra.mxu2 %vm385_vm0, %v425_v48  ;;  %1242 = vmatmul.msk.bf16.vlgmr.msra.gmra.mxu3 %vm385_vm0, %v425_v48 }
  0xc3   : > { %v1645_v49 = vpop.f32.mrf.mxu0  ;;  %v1647_v50 = vpop.f32.mrf.mxu1 }
  0xc4   : > { %v507_v51 = vrot.slane %v1645_v49, 4  ;;  %v531_v52 = vmul.f32 %v1645_v49, %v1645_v49  ;;  %v513_v53 = vrot.slane %v1647_v50, 4  ;;  %v532_v54 = vmul.f32 %v1647_v50, %v1647_v50 }
  0xc6   : > { %v508_v55 = vadd.f32 %v507_v51, %v1645_v49  ;;  %v535_v56 = vrot.slane %v531_v52, 4  ;;  %v514_v57 = vadd.f32 %v513_v53, %v1647_v50  ;;  %v541_v58 = vrot.slane %v532_v54, 4 }
  0xc8   : > { %v509_v59 = vrot.slane %v508_v55, 2  ;;  %v536_v60 = vadd.f32 %v535_v56, %v531_v52  ;;  %v515_v61 = vrot.slane %v514_v57, 2  ;;  %v542_v62 = vadd.f32 %v541_v58, %v532_v54 }
  0xca   : > { %v510_v63 = vadd.f32 %v509_v59, %v508_v55  ;;  %v537_v0 = vrot.slane %v536_v60, 2  ;;  %v516_v1 = vadd.f32 %v515_v61, %v514_v57  ;;  %v543_v2 = vrot.slane %v542_v62, 2  ;;  %v1657_v3 = vpop.f32.mrf.mxu2  ;;  %v1659_v4 = vpop.f32.mrf.mxu3 }
  0xcb   : > { %v519_v5 = vrot.slane %v1657_v3, 4  ;;  %v533_v6 = vmul.f32 %v1657_v3, %v1657_v3  ;;  %v464_v7 = vpop.f32.mrf.mxu0  ;;  %v477_v8 = vpop.f32.mrf.mxu1  ;;  %v525_v15 = vrot.slane %v1659_v4, 4  ;;  %v534_v16 = vmul.f32 %v1659_v4, %v1659_v4 }
  0xcc   : > { %v511_v9 = vrot.slane %v510_v63, 1  ;;  %v538_v10 = vadd.f32 %v537_v0, %v536_v60  ;;  %v517_v11 = vrot.slane %v516_v1, 1  ;;  %v544_v12 = vadd.f32 %v543_v2, %v542_v62 }
  0xcd   : > { %v520_v13 = vadd.f32 %v519_v5, %v1657_v3  ;;  %v547_v14 = vrot.slane %v533_v6, 4  ;;  %v526_v23 = vadd.f32 %v525_v15, %v1659_v4  ;;  %v553_v27 = vrot.slane %v534_v16, 4 }
  0xce   : > { %v512_v17 = vadd.f32 %v511_v9, %v510_v63  ;;  %v539_v18 = vrot.slane %v538_v10, 1  ;;  %v518_v19 = vadd.f32 %v517_v11, %v516_v1  ;;  %v545_v20 = vrot.slane %v544_v12, 1 }
  0xcf   : > { %v521_v21 = vrot.slane %v520_v13, 2  ;;  %v548_v22 = vadd.f32 %v547_v14, %v533_v6  ;;  %v527_v40 = vrot.slane %v526_v23, 2  ;;  %v554_v41 = vadd.f32 %v553_v27, %v534_v16  ;;  %v1688_v16 = vld [vmem:[%s1855_s7] sm:$0xf] }
  0xd0   : > { %v540_v24 = vadd.f32 %v539_v18, %v538_v10  ;;  %v1669_v25 = vmul.f32 0.125, %v512_v17  ;;  %v546_v26 = vadd.f32 %v545_v20, %v544_v12  ;;  %v1671_v28 = vmul.f32 0.125, %v518_v19  ;;  %v506_v27 = vld [vmem:[%s1856_s8] sm:$0xf] }
  0xd1   : > { %v522_v29 = vadd.f32 %v521_v21, %v520_v13  ;;  %v549_v30 = vrot.slane %v548_v22, 2  ;;  %v528_v46 = vadd.f32 %v527_v40, %v526_v23  ;;  %v555_v47 = vrot.slane %v554_v41, 2 }
  0xd2   : > { %v563_v31 = vmul.f32 0.125, %v540_v24  ;;  %v567_v32 = vmul.f32 %v1669_v25, %v1669_v25  ;;  %v564_v33 = vmul.f32 0.125, %v546_v26  ;;  %v490_v34 = vpop.f32.mrf.mxu2  ;;  %v503_v35 = vpop.f32.mrf.mxu3  ;;  %v568_v36 = vmul.f32 %v1671_v28, %v1671_v28 }
  0xd3   : > { %v523_v37 = vrot.slane %v522_v29, 1  ;;  %v550_v38 = vadd.f32 %v549_v30, %v548_v22  ;;  %v529_v54 = vrot.slane %v528_v46, 1  ;;  %v556_v55 = vadd.f32 %v555_v47, %v554_v41 }
  0xd4   : > { %v571_v39 = vsub.f32 %v563_v31, %v567_v32  ;;  %v572_v42 = vsub.f32 %v564_v33, %v568_v36  ;;  %v1528_v15 = vmov 0.0   ;;  %v628_v21 = vperm.slane %v1688_v16, 0 }
  0xd5   : > { %v524_v43 = vadd.f32 %v523_v37, %v522_v29  ;;  %v551_v44 = vrot.slane %v550_v38, 1  ;;  %v530_v59 = vadd.f32 %v529_v54, %v528_v46  ;;  %v557_v60 = vrot.slane %v556_v55, 1  ;;  %669 = vst [vmem:[#allocation3] sm:$0xff] %v1528_v15 }
  0xd6   : > { %v575_v45 = vmax.f32 %v571_v39, 0.0  ;;  %v576_v48 = vmax.f32 %v572_v42, 0.0  ;;  %670 = vst [vmem:[#allocation3 + $0x8] sm:$0xff] %v1528_v15  ;;  %v629_v26 = vperm.slane %v1688_v16, 1  ;;  %v649_v36 = vperm.slane %v506_v27, 0 }
  0xd7   : > { %v552_v51 = vadd.f32 %v551_v44, %v550_v38  ;;  %v1677_v52 = vmul.f32 0.125, %v524_v43  ;;  %v558_v62 = vadd.f32 %v557_v60, %v556_v55  ;;  %v1681_v63 = vmul.f32 0.125, %v530_v59 }
  0xd8   : > { %v583_v53 = vadd.f32 1e-05, %v575_v45  ;;  %v584_v56 = vadd.f32 1e-05, %v576_v48  ;;  %v650_v38 = vperm.slane %v506_v27, 1  ;;  %v579_v40 = vsub.f32 %v1645_v49, %v1669_v25 }
  0xd9   : > { %v565_v57 = vmul.f32 0.125, %v552_v51  ;;  %v569_v58 = vmul.f32 %v1677_v52, %v1677_v52  ;;  %v566_v1 = vmul.f32 0.125, %v558_v62  ;;  %v570_v2 = vmul.f32 %v1681_v63, %v1681_v63 }
  0xda   : > { %1505 = vrsqrt.f32 %v583_v53  ;;  %vm593_vm6 = vweird.f32 %v583_v53  ;;  %vm603_vm8 = vweird.f32 %v584_v56  ;;  %v580_v43 = vsub.f32 %v1647_v50, %v1671_v28 }
  0xdb   : > { %1507 = vrsqrt.f32 %v584_v56  ;;  %v573_v61 = vsub.f32 %v565_v57, %v569_v58  ;;  %v574_v7 = vsub.f32 %v566_v1, %v570_v2  ;;  %v630_v45 = vperm.slane %v1688_v16, 2 }
  0xdc   : > { %v581_v50 = vsub.f32 %v1657_v3, %v1677_v52  ;;  %v631_v28 = vperm.slane %v1688_v16, 3 }
  0xdd   : > { %v577_v0 = vmax.f32 %v573_v61, 0.0  ;;  %v578_v11 = vmax.f32 %v574_v7, 0.0  ;;  %v651_v61 = vperm.slane %v506_v27, 2 }
  0xdf   : > { %v585_v5 = vadd.f32 1e-05, %v577_v0  ;;  %v586_v14 = vadd.f32 1e-05, %v578_v11 }
  0xe0   : > { %v1506_v6 = vpop.eup %1505 }
  0xe1   : > { %v1508_v8 = vpop.eup %1507  ;;  %v588_v9 = vmul.f32 %v1506_v6, %v583_v53  ;;  %1509 = vrsqrt.f32 %v585_v5  ;;  %vm594_vm4 = vweird.f32 %v1506_v6  ;;  %vm613_vm11 = vweird.f32 %v585_v5 }
  0xe2   : > { %v598_v10 = vmul.f32 %v1508_v8, %v584_v56  ;;  %1511 = vrsqrt.f32 %v586_v14  ;;  %vm604_vm5 = vweird.f32 %v1508_v8  ;;  %vm595_vm7 = vmor %vm593_vm6, %vm594_vm4  ;;  %vm623_vm14 = vweird.f32 %v586_v14 }
  0xe3   : > { %v589_v12 = vmul.f32 %v1506_v6, %v588_v9  ;;  %vm605_vm9 = vmor %vm603_vm8, %vm604_vm5 }
  0xe4   : > { %v599_v13 = vmul.f32 %v1508_v8, %v598_v10 }
  0xe5   : > { %v590_v17 = vmul.f32 0.5, %v589_v12 }
  0xe6   : > { %v600_v18 = vmul.f32 0.5, %v599_v13 }
  0xe7   : > { %v1510_v19 = vpop.eup %1509  ;;  %v591_v20 = vsub.f32 1.5, %v590_v17 }
  0xe8   : > { %v601_v22 = vsub.f32 1.5, %v600_v18  ;;  %v608_v23 = vmul.f32 %v1510_v19, %v585_v5  ;;  %v1512_v32 = vpop.eup %1511  ;;  %vm614_vm10 = vweird.f32 %v1510_v19 }
  0xe9   : > { %v592_v24 = vmul.f32 %v1506_v6, %v591_v20  ;;  %v618_v39 = vmul.f32 %v1512_v32, %v586_v14  ;;  %vm615_vm12 = vmor %vm613_vm11, %vm614_vm10  ;;  %vm624_vm13 = vweird.f32 %v1512_v32 }
  0xea   : > { %v602_v29 = vmul.f32 %v1508_v8, %v601_v22  ;;  %v609_v30 = vmul.f32 %v1510_v19, %v608_v23  ;;  %vm625_vm15 = vmor %vm623_vm14, %vm624_vm13 }
  0xeb   : > { %v596_v31 = vsel %vm595_vm7, %v1506_v6, %v592_v24  ;;  %v619_v46 = vmul.f32 %v1512_v32, %v618_v39  ;;  %v582_v6 = vsub.f32 %v1659_v4, %v1681_v63 }
  0xec   : > { %v636_v33 = vmul.f32 %v628_v21, %v596_v31  ;;  %v606_v34 = vsel %vm605_vm9, %v1508_v8, %v602_v29  ;;  %v610_v35 = vmul.f32 0.5, %v609_v30  ;;  %v652_v8 = vperm.slane %v506_v27, 3 }
  0xed   : > { %v637_v37 = vmul.f32 %v629_v26, %v606_v34  ;;  %v620_v53 = vmul.f32 0.5, %v619_v46 }
  0xee   : > { %v640_v41 = vperm.slane %v636_v33, 0  ;;  %v611_v42 = vsub.f32 1.5, %v610_v35 }
  0xef   : > { %v641_v44 = vperm.slane %v637_v37, 0  ;;  %v621_v25 = vsub.f32 1.5, %v620_v53 }
  0xf0   : > { %v644_v47 = vmul.f32 %v640_v41, %v579_v40  ;;  %v612_v48 = vmul.f32 %v1510_v19, %v611_v42 }
  0xf1   : > { %v645_v51 = vmul.f32 %v641_v44, %v580_v43  ;;  %v622_v60 = vmul.f32 %v1512_v32, %v621_v25 }
  0xf2   : > { %v657_v54 = vadd.f32 %v649_v36, %v644_v47  ;;  %v616_v55 = vsel %vm615_vm12, %v1510_v19, %v612_v48 }
  0xf3   : > { %v658_v56 = vadd.f32 %v650_v38, %v645_v51  ;;  %v638_v49 = vmul.f32 %v630_v45, %v616_v55  ;;  %v626_v1 = vsel %vm625_vm15, %v1512_v32, %v622_v60 }
  0xf4   : > { %v661_v57 = vmax.f32 %v657_v54, 0.0  ;;  %v639_v2 = vmul.f32 %v631_v28, %v626_v1 }
  0xf5   : > { %v662_v58 = vmax.f32 %v658_v56, 0.0  ;;  %v642_v59 = vperm.slane %v638_v49, 0 }
  0xf6   : > { %v643_v7 = vperm.slane %v639_v2, 0 }
  0xf7   : > { %v665_v62 = vpack.c.bf16 %v662_v58, %v661_v57  ;;  %v646_v0 = vmul.f32 %v642_v59, %v581_v50 }
  0xf8   : > { %v647_v3 = vmul.f32 %v643_v7, %v582_v6 }
  0xf9   : > { %667 = vst [vmem:[#allocation2] sm:$0xff] %v665_v62  ;;  %v659_v5 = vadd.f32 %v651_v61, %v646_v0 }
  0xfa   : > { %v660_v9 = vadd.f32 %v652_v8, %v647_v3 }
  0xfb   : > { %v663_v52 = vmax.f32 %v659_v5, 0.0 }
  0xfc   : > { %v664_v10 = vmax.f32 %v660_v9, 0.0 }
  0xfe   : > { %v666_v11 = vpack.c.bf16 %v664_v10, %v663_v52 }
 0x100   : > { %668 = vst [vmem:[#allocation2 + $0x8] sm:$0xff] %v666_v11 }
 0x101 PF: > { %v1303_v4 = vld [vmem:[%s1603_s23 + $0x70] sm:$0xf]  ;;  %v1460_v63 = vld [vmem:[%s1603_s23 + $0x74] sm:$0xf0]  ;;  %v1459_v15 = vld [vmem:[%s1603_s23 + $0x74] sm:$0xf] }
 0x102   : > { %v1367_v12 = vld [vmem:[%s1603_s23 + $0xf0] sm:$0xf]  ;;  %v1304_v13 = vor.u32 %v1460_v63, %v1303_v4  ;;  %v1476_v14 = vld [vmem:[%s1603_s23 + $0xf4] sm:$0xf0]  ;;  %v1305_v16 = vld [vmem:[%s1603_s23 + $0x78] sm:$0xf0] }
 0x103   : > { %v1368_v17 = vor.u32 %v1476_v14, %v1367_v12  ;;  %v1308_v18 = vor.u32 %v1459_v15, %v1305_v16  ;;  %v1475_v19 = vld [vmem:[%s1603_s23 + $0xf4] sm:$0xf]  ;;  %v1369_v20 = vld [vmem:[%s1603_s23 + $0xf8] sm:$0xf0]  ;;  %v1295_v21 = vld [vmem:[%s1603_s23 + $0x60] sm:$0xf] }
 0x104   : > { %878 = vmatpush.bf16.msra.mxu0 %v1304_v13  ;;  %v1372_v22 = vor.u32 %v1475_v19, %v1369_v20  ;;  %v1458_v23 = vld [vmem:[%s1603_s23 + $0x64] sm:$0xf0]  ;;  %v1359_v24 = vld [vmem:[%s1603_s23 + $0xe0] sm:$0xf]  ;;  %v1457_v30 = vld [vmem:[%s1603_s23 + $0x64] sm:$0xf] }
 0x105   : > { %v1474_v26 = vld [vmem:[%s1603_s23 + $0xe4] sm:$0xf0]  ;;  %891 = vmatpush.bf16.msra.mxu1 %v1368_v17  ;;  %904 = vmatpush.bf16.msra.mxu2 %v1308_v18  ;;  %v1296_v27 = vor.u32 %v1458_v23, %v1295_v21  ;;  %v1297_v31 = vld [vmem:[%s1603_s23 + $0x68] sm:$0xf0]  ;;  %v1473_v32 = vld [vmem:[%s1603_s23 + $0xe4] sm:$0xf] }
 0x106   : > { %v1360_v29 = vor.u32 %v1474_v26, %v1359_v24  ;;  %917 = vmatpush.bf16.msra.mxu3 %v1372_v22  ;;  %v1300_v33 = vor.u32 %v1457_v30, %v1297_v31  ;;  %v1361_v34 = vld [vmem:[%s1603_s23 + $0xe8] sm:$0xf0]  ;;  %v1287_v35 = vld [vmem:[%s1603_s23 + $0x50] sm:$0xf]  ;;  %v1456_v36 = vld [vmem:[%s1603_s23 + $0x54] sm:$0xf0] }
 0x107   : > { %v1364_v37 = vor.u32 %v1473_v32, %v1361_v34  ;;  %v1351_v38 = vld [vmem:[%s1603_s23 + $0xd0] sm:$0xf]  ;;  %v1472_v39 = vld [vmem:[%s1603_s23 + $0xd4] sm:$0xf0]  ;;  %v1455_v40 = vld [vmem:[%s1603_s23 + $0x54] sm:$0xf]  ;;  %v1288_v41 = vor.u32 %v1456_v36, %v1287_v35 }
 0x108   : > { %879 = vmatpush.bf16.msra.mxu0 %v1296_v27  ;;  %v1289_v42 = vld [vmem:[%s1603_s23 + $0x58] sm:$0xf0]  ;;  %v1471_v43 = vld [vmem:[%s1603_s23 + $0xd4] sm:$0xf]  ;;  %v1352_v45 = vor.u32 %v1472_v39, %v1351_v38  ;;  %v1279_v47 = vld [vmem:[%s1603_s23 + $0x40] sm:$0xf] }
 0x109   : > { %v1353_v44 = vld [vmem:[%s1603_s23 + $0xd8] sm:$0xf0]  ;;  %892 = vmatpush.bf16.msra.mxu1 %v1360_v29  ;;  %905 = vmatpush.bf16.msra.mxu2 %v1300_v33  ;;  %v1292_v46 = vor.u32 %v1455_v40, %v1289_v42  ;;  %v1454_v48 = vld [vmem:[%s1603_s23 + $0x44] sm:$0xf0]  ;;  %v1343_v51 = vld [vmem:[%s1603_s23 + $0xc0] sm:$0xf] }
 0x10a   : > { %918 = vmatpush.bf16.msra.mxu3 %v1364_v37  ;;  %v1356_v53 = vor.u32 %v1471_v43, %v1353_v44  ;;  %v1470_v54 = vld [vmem:[%s1603_s23 + $0xc4] sm:$0xf0]  ;;  %v1453_v55 = vld [vmem:[%s1603_s23 + $0x44] sm:$0xf]  ;;  %v1281_v56 = vld [vmem:[%s1603_s23 + $0x48] sm:$0xf0]  ;;  %v1280_v57 = vor.u32 %v1454_v48, %v1279_v47 }
 0x10b   : > { %v1469_v49 = vld [vmem:[%s1603_s23 + $0xc4] sm:$0xf]  ;;  %v1345_v25 = vld [vmem:[%s1603_s23 + $0xc8] sm:$0xf0]  ;;  %v1344_v50 = vor.u32 %v1470_v54, %v1343_v51  ;;  %v1284_v28 = vor.u32 %v1453_v55, %v1281_v56  ;;  %v1271_v58 = vld [vmem:[%s1603_s23 + $0x30] sm:$0xf] }
 0x10c   : > { %880 = vmatpush.bf16.msra.mxu0 %v1288_v41  ;;  %v1452_v59 = vld [vmem:[%s1603_s23 + $0x34] sm:$0xf0]  ;;  %v1335_v60 = vld [vmem:[%s1603_s23 + $0xb0] sm:$0xf]  ;;  %v1348_v61 = vor.u32 %v1469_v49, %v1345_v25  ;;  %v1451_v0 = vld [vmem:[%s1603_s23 + $0x34] sm:$0xf] }
 0x10d   : > { %893 = vmatpush.bf16.msra.mxu1 %v1352_v45  ;;  %906 = vmatpush.bf16.msra.mxu2 %v1292_v46  ;;  %v1468_v62 = vld [vmem:[%s1603_s23 + $0xb4] sm:$0xf0]  ;;  %v1273_v1 = vld [vmem:[%s1603_s23 + $0x38] sm:$0xf0]  ;;  %v1467_v2 = vld [vmem:[%s1603_s23 + $0xb4] sm:$0xf]  ;;  %v1272_v6 = vor.u32 %v1452_v59, %v1271_v58 }
 0x10e   : > { %919 = vmatpush.bf16.msra.mxu3 %v1356_v53  ;;  %v1337_v5 = vld [vmem:[%s1603_s23 + $0xb8] sm:$0xf0]  ;;  %v1336_v7 = vor.u32 %v1468_v62, %v1335_v60  ;;  %v1276_v8 = vor.u32 %v1451_v0, %v1273_v1  ;;  %v1263_v3 = vld [vmem:[%s1603_s23 + $0x20] sm:$0xf]  ;;  %v1450_v52 = vld [vmem:[%s1603_s23 + $0x24] sm:$0xf0] }
 0x10f   : > { %v1327_v9 = vld [vmem:[%s1603_s23 + $0xa0] sm:$0xf]  ;;  %v1340_v10 = vor.u32 %v1467_v2, %v1337_v5  ;;  %v1466_v11 = vld [vmem:[%s1603_s23 + $0xa4] sm:$0xf0]  ;;  %v1449_v4 = vld [vmem:[%s1603_s23 + $0x24] sm:$0xf]  ;;  %v1264_v14 = vor.u32 %v1450_v52, %v1263_v3 }
 0x110   : > { %881 = vmatpush.bf16.msra.mxu0 %v1280_v57  ;;  %v1265_v63 = vld [vmem:[%s1603_s23 + $0x28] sm:$0xf0]  ;;  %v1465_v12 = vld [vmem:[%s1603_s23 + $0xa4] sm:$0xf]  ;;  %v1255_v15 = vld [vmem:[%s1603_s23 + $0x10] sm:$0xf]  ;;  %v1328_v16 = vor.u32 %v1466_v11, %v1327_v9 }
 0x111   : > { %894 = vmatpush.bf16.msra.mxu1 %v1344_v50  ;;  %907 = vmatpush.bf16.msra.mxu2 %v1284_v28  ;;  %v1329_v13 = vld [vmem:[%s1603_s23 + $0xa8] sm:$0xf0]  ;;  %v1268_v17 = vor.u32 %v1449_v4, %v1265_v63  ;;  %v1448_v18 = vld [vmem:[%s1603_s23 + $0x14] sm:$0xf0]  ;;  %v1319_v19 = vld [vmem:[%s1603_s23 + $0x90] sm:$0xf] }
 0x112   : > { %920 = vmatpush.bf16.msra.mxu3 %v1348_v61  ;;  %v1464_v20 = vld [vmem:[%s1603_s23 + $0x94] sm:$0xf0]  ;;  %v1332_v21 = vor.u32 %v1465_v12, %v1329_v13  ;;  %v1447_v22 = vld [vmem:[%s1603_s23 + $0x14] sm:$0xf]  ;;  %v1257_v23 = vld [vmem:[%s1603_s23 + $0x18] sm:$0xf0]  ;;  %v1256_v27 = vor.u32 %v1448_v18, %v1255_v15 }
 0x113   : > { %s1243_s15 = sshll.u32 %s1595_s18, 8  ;;  %v1463_v24 = vld [vmem:[%s1603_s23 + $0x94] sm:$0xf]  ;;  %v1321_v26 = vld [vmem:[%s1603_s23 + $0x98] sm:$0xf0]  ;;  %v1320_v31 = vor.u32 %v1464_v20, %v1319_v19  ;;  %v1260_v32 = vor.u32 %v1447_v22, %v1257_v23  ;;  %p1373_p5 = scmp.ne.s32.totalorder %s1595_s18, 1 }
 0x114   : > { %882 = vmatpush.bf16.msra.mxu0 %v1272_v6  ;;  %s672_s16 = sshra.s32 %s1243_s15, 7  ;;  %v1247_v29 = vld [vmem:[%s1603_s23] sm:$0xf]  ;;  %v1446_v30 = vld [vmem:[%s1603_s23 + $0x4] sm:$0xf0]  ;;  %v1324_v35 = vor.u32 %v1463_v24, %v1321_v26  ;;  %v677_v53 = vld [vmem:[#allocation3] sm:$0xff] }
 0x115   : > { %895 = vmatpush.bf16.msra.mxu1 %v1336_v7  ;;  %908 = vmatpush.bf16.msra.mxu2 %v1276_v8  ;;  %s1244_s19 = sshll.u32 %s672_s16, 2  ;;  %v1311_v33 = vld [vmem:[%s1603_s23 + $0x80] sm:$0xf]  ;;  %v1462_v34 = vld [vmem:[%s1603_s23 + $0x84] sm:$0xf0]  ;;  %v1248_v42 = vor.u32 %v1446_v30, %v1247_v29  ;;  %v678_v25 = vld [vmem:[#allocation3 + $0x8] sm:$0xff] }
 0x116   : > { %921 = vmatpush.bf16.msra.mxu3 %v1340_v10  ;;  %v1445_v36 = vld [vmem:[%s1603_s23 + $0x4] sm:$0xf]  ;;  %v1249_v37 = vld [vmem:[%s1603_s23 + $0x8] sm:$0xf0]  ;;  %s675_s20 = scalar_lea.vmem [#allocation2], %s1244_s19  ;;  %v1312_v44 = vor.u32 %v1462_v34, %v1311_v33 }
 0x117   : > { %v676_v38 = vld [vmem:[%s675_s20] sm:$0xff]  ;;  %v1313_v40 = vld [vmem:[%s1603_s23 + $0x88] sm:$0xf0]  ;;  %v1252_v45 = vor.u32 %v1445_v36, %v1249_v37 }
 0x118   : > { %883 = vmatpush.bf16.msra.mxu0 %v1264_v14  ;;  %v1461_v39 = vld [vmem:[%s1603_s23 + $0x84] sm:$0xf]  ;;  %v712_v41 = vunpack.c.l.b16 %v676_v38  ;;  %v713_v43 = vunpack.c.h.b16 %v676_v38 }
 0x119   : > { %896 = vmatpush.bf16.msra.mxu1 %v1328_v16  ;;  %909 = vmatpush.bf16.msra.mxu2 %v1268_v17  ;;  %v1316_v46 = vor.u32 %v1461_v39, %v1313_v40 }
 0x11a   : > { %922 = vmatpush.bf16.msra.mxu3 %v1332_v21  ;;  %v714_v47 = vpack.c.b16 %v712_v41, %v712_v41  ;;  %v715_v48 = vpack.c.b16 %v713_v43, %v713_v43 }
 0x11c   : > { %884 = vmatpush.bf16.msra.mxu0 %v1256_v27 }
 0x11d   : > { %897 = vmatpush.bf16.msra.mxu1 %v1320_v31  ;;  %910 = vmatpush.bf16.msra.mxu2 %v1260_v32 }
 0x11e   : > { %923 = vmatpush.bf16.msra.mxu3 %v1324_v35 }
 0x120   : > { %885 = vmatpush.bf16.msra.mxu0 %v1248_v42 }
 0x121   : > { %898 = vmatpush.bf16.msra.mxu1 %v1312_v44  ;;  %911 = vmatpush.bf16.msra.mxu2 %v1252_v45 }
 0x122   : > { %924 = vmatpush.bf16.msra.mxu3 %v1316_v46 }
 0x123   : > { %886 = vmatmul.bf16.vlgmr.msra.gmra.mxu0 %v714_v47 }
 0x124   : > { %899 = vmatmul.bf16.vlgmr.msra.gmra.mxu1 %v715_v48  ;;  %912 = vmatmul.bf16.vlgmr.msra.gmra.mxu2 %v714_v47 }
 0x125   : > { %925 = vmatmul.bf16.vlgmr.msra.gmra.mxu3 %v715_v48 }
 0x1a0   : > { %v887_v51 = vpop.f32.mrf.mxu0 }
 0x1a1   : > { %v900_v54 = vpop.f32.mrf.mxu1 }
 0x1a2   : > { %v901_v55 = vadd.f32 %v900_v54, %v887_v51 }
 0x1a4   : > { %v930_v56 = vadd.f32 %v901_v55, %v677_v53 }
 0x1a6   : > { %932 = vst [vmem:[#allocation3] sm:$0xff] %v930_v56 }
 0x1a7   : > { %v913_v49 = vpop.f32.mrf.mxu2 }
 0x1a8   : > { %v926_v57 = vpop.f32.mrf.mxu3  ;;  %v889_v50 = vpop.f32.mrf.mxu0 }
 0x1a9   : > { %v927_v28 = vadd.f32 %v926_v57, %v913_v49  ;;  %v902_v58 = vpop.f32.mrf.mxu1 }
 0x1ab   : > { %v931_v59 = vadd.f32 %v927_v28, %v678_v25 }
 0x1ac   : > { %937 = sbr.rel (%p1373_p5) target bundleno = 626 (0x272), region = 72 }
 0x1ad   : > { %933 = vst [vmem:[#allocation3 + $0x8] sm:$0xff] %v931_v59 }
 0x1af   : > { %v915_v60 = vpop.f32.mrf.mxu2 }
 0x1b0   : > { %v928_v61 = vpop.f32.mrf.mxu3 }
 0x1b1   : > { %v1484_v62 = vld [vmem:[%s1851_s3 + $0x38] sm:$0xff]  ;;  %v1483_v1 = vld [vmem:[%s1851_s3 + $0x30] sm:$0xff]  ;;  %v1482_v5 = vld [vmem:[%s1851_s3 + $0x28] sm:$0xff]  ;;  %vm1183_vm6 = vcmask 31744  }
 0x1b2   : > { %v1492_v0 = vld [vmem:[%s1851_s3 + $0x78] sm:$0xff]  ;;  %1156 = vmatpush.bf16.msra.mxu0 %v1484_v62  ;;  %v1491_v2 = vld [vmem:[%s1851_s3 + $0x70] sm:$0xff]  ;;  %v1490_v7 = vld [vmem:[%s1851_s3 + $0x68] sm:$0xff] }
 0x1b3   : > { %1169 = vmatpush.bf16.msra.mxu1 %v1492_v0  ;;  %v1786_v6 = vld [vmem:[#allocation3] sm:$0xff]  ;;  %v1481_v13 = vld [vmem:[%s1851_s3 + $0x20] sm:$0xff]  ;;  %v1480_v23 = vld [vmem:[%s1851_s3 + $0x18] sm:$0xff] }
 0x1b4   : > { %v942_v8 = vrot.slane %v1786_v6, 4  ;;  %v954_v3 = vmul.f32 %v1786_v6, %v1786_v6  ;;  %v1794_v52 = vld [vmem:[#allocation3 + $0x8] sm:$0xff]  ;;  %v1489_v14 = vld [vmem:[%s1851_s3 + $0x60] sm:$0xff]  ;;  %v1479_v35 = vld [vmem:[%s1851_s3 + $0x10] sm:$0xff] }
 0x1b5   : > { %v948_v9 = vrot.slane %v1794_v52, 4  ;;  %v955_v10 = vmul.f32 %v1794_v52, %v1794_v52  ;;  %v1488_v24 = vld [vmem:[%s1851_s3 + $0x58] sm:$0xff]  ;;  %v1487_v36 = vld [vmem:[%s1851_s3 + $0x50] sm:$0xff]  ;;  %v1478_v45 = vld [vmem:[%s1851_s3 + $0x8] sm:$0xff] }
 0x1b6   : > { %1157 = vmatpush.bf16.msra.mxu0 %v1483_v1  ;;  %v943_v11 = vadd.f32 %v942_v8, %v1786_v6  ;;  %v956_v4 = vrot.slane %v954_v3, 4  ;;  %v1486_v46 = vld [vmem:[%s1851_s3 + $0x48] sm:$0xff]  ;;  %v1477_v54 = vld [vmem:[%s1851_s3] sm:$0xff] }
 0x1b7   : > { %1170 = vmatpush.bf16.msra.mxu1 %v1491_v2  ;;  %v949_v63 = vadd.f32 %v948_v9, %v1794_v52  ;;  %v962_v12 = vrot.slane %v955_v10, 4  ;;  %v1485_v55 = vld [vmem:[%s1851_s3 + $0x40] sm:$0xff] }
 0x1b8   : > { %v944_v15 = vrot.slane %v943_v11, 2  ;;  %v957_v16 = vadd.f32 %v956_v4, %v954_v3  ;;  %v940_v60 = vld [vmem:[%s1857_s9] sm:$0x3] }
 0x1b9   : > { %v950_v17 = vrot.slane %v949_v63, 2  ;;  %v963_v18 = vadd.f32 %v962_v12, %v955_v10  ;;  %v1003_v1 = vperm.slane %v940_v60, 0  ;;  %v941_v3 = vld [vmem:[%s1858_s10] sm:$0x3] }
 0x1ba   : > { %1158 = vmatpush.bf16.msra.mxu0 %v1482_v5  ;;  %v945_v19 = vadd.f32 %v944_v15, %v943_v11  ;;  %v958_v20 = vrot.slane %v957_v16, 2 }
 0x1bb   : > { %1171 = vmatpush.bf16.msra.mxu1 %v1490_v7  ;;  %v951_v21 = vadd.f32 %v950_v17, %v949_v63  ;;  %v964_v22 = vrot.slane %v963_v18, 2  ;;  %v1004_v7 = vperm.slane %v940_v60, 1 }
 0x1bc   : > { %v946_v26 = vrot.slane %v945_v19, 1  ;;  %v959_v27 = vadd.f32 %v958_v20, %v957_v16  ;;  %v1015_v16 = vperm.slane %v941_v3, 1 }
 0x1bd   : > { %v952_v29 = vrot.slane %v951_v21, 1  ;;  %v965_v30 = vadd.f32 %v964_v22, %v963_v18 }
 0x1be   : > { %1159 = vmatpush.bf16.msra.mxu0 %v1481_v13  ;;  %v947_v31 = vadd.f32 %v946_v26, %v945_v19  ;;  %v960_v32 = vrot.slane %v959_v27, 1 }
 0x1bf   : > { %1172 = vmatpush.bf16.msra.mxu1 %v1489_v14  ;;  %v953_v33 = vadd.f32 %v952_v29, %v951_v21  ;;  %v966_v34 = vrot.slane %v965_v30, 1  ;;  %v1014_v14 = vperm.slane %v941_v3, 0 }
 0x1c0   : > { %v961_v37 = vadd.f32 %v960_v32, %v959_v27  ;;  %v968_v38 = vmul.f32 0.125, %v947_v31 }
 0x1c1   : > { %v967_v39 = vadd.f32 %v966_v34, %v965_v30  ;;  %v969_v40 = vmul.f32 0.125, %v953_v33 }
 0x1c2   : > { %1160 = vmatpush.bf16.msra.mxu0 %v1480_v23  ;;  %v970_v41 = vmul.f32 0.125, %v961_v37  ;;  %v972_v42 = vmul.f32 %v968_v38, %v968_v38  ;;  %v978_v10 = vsub.f32 %v1786_v6, %v968_v38  ;;  %v1513_v6 = vld [vmem:[%s1852_s4] ss:$0 sm:$0xff] }
 0x1c3   : > { %1173 = vmatpush.bf16.msra.mxu1 %v1488_v24  ;;  %v971_v43 = vmul.f32 0.125, %v967_v39  ;;  %v973_v44 = vmul.f32 %v969_v40, %v969_v40  ;;  %v979_v63 = vsub.f32 %v1794_v52, %v969_v40 }
 0x1c4   : > { %v974_v47 = vsub.f32 %v970_v41, %v972_v42 }
 0x1c5   : > { %v975_v48 = vsub.f32 %v971_v43, %v973_v44 }
 0x1c6   : > { %1161 = vmatpush.bf16.msra.mxu0 %v1479_v35  ;;  %v976_v51 = vmax.f32 %v974_v47, 0.0 }
 0x1c7   : > { %1174 = vmatpush.bf16.msra.mxu1 %v1487_v36  ;;  %v977_v53 = vmax.f32 %v975_v48, 0.0 }
 0x1c8   : > { %v980_v56 = vadd.f32 1e-05, %v976_v51 }
 0x1c9   : > { %v981_v49 = vadd.f32 1e-05, %v977_v53 }
 0x1ca   : > { %1162 = vmatpush.bf16.msra.mxu0 %v1478_v45  ;;  %1514 = vrsqrt.f32 %v980_v56  ;;  %vm988_vm0 = vweird.f32 %v980_v56 }
 0x1cb   : > { %1175 = vmatpush.bf16.msra.mxu1 %v1486_v46  ;;  %1516 = vrsqrt.f32 %v981_v49  ;;  %vm998_vm2 = vweird.f32 %v981_v49 }
 0x1ce   : > { %1163 = vmatpush.bf16.msra.mxu0 %v1477_v54 }
 0x1cf   : > { %1176 = vmatpush.bf16.msra.mxu1 %v1485_v55 }
 0x1d0   : > { %v1515_v25 = vpop.eup %1514 }
 0x1d1   : > { %v1517_v57 = vpop.eup %1516  ;;  %v983_v50 = vmul.f32 %v1515_v25, %v980_v56  ;;  %vm989_vm1 = vweird.f32 %v1515_v25 }
 0x1d2   : > { %v993_v28 = vmul.f32 %v1517_v57, %v981_v49  ;;  %vm999_vm3 = vweird.f32 %v1517_v57  ;;  %vm990_vm4 = vmor %vm988_vm0, %vm989_vm1 }
 0x1d3   : > { %v984_v58 = vmul.f32 %v1515_v25, %v983_v50  ;;  %vm1000_vm5 = vmor %vm998_vm2, %vm999_vm3 }
 0x1d4   : > { %v994_v59 = vmul.f32 %v1517_v57, %v993_v28 }
 0x1d5   : > { %v985_v61 = vmul.f32 0.5, %v984_v58 }
 0x1d6   : > { %v995_v62 = vmul.f32 0.5, %v994_v59 }
 0x1d7   : > { %v986_v0 = vsub.f32 1.5, %v985_v61 }
 0x1d8   : > { %v996_v2 = vsub.f32 1.5, %v995_v62 }
 0x1d9   : > { %v987_v5 = vmul.f32 %v1515_v25, %v986_v0 }
 0x1da   : > { %v997_v8 = vmul.f32 %v1517_v57, %v996_v2 }
 0x1db   : > { %v991_v9 = vsel %vm990_vm4, %v1515_v25, %v987_v5 }
 0x1dc   : > { %v1007_v11 = vmul.f32 %v1003_v1, %v991_v9  ;;  %v1001_v4 = vsel %vm1000_vm5, %v1517_v57, %v997_v8 }
 0x1dd   : > { %v1008_v12 = vmul.f32 %v1004_v7, %v1001_v4 }
 0x1de   : > { %v1009_v13 = vperm.slane %v1007_v11, 0 }
 0x1df   : > { %v1010_v15 = vperm.slane %v1008_v12, 0 }
 0x1e0   : > { %v1011_v17 = vmul.f32 %v1009_v13, %v978_v10 }
 0x1e1   : > { %v1012_v18 = vmul.f32 %v1010_v15, %v979_v63 }
 0x1e2   : > { %v1018_v19 = vadd.f32 %v1014_v14, %v1011_v17 }
 0x1e3   : > { %v1019_v20 = vadd.f32 %v1015_v16, %v1012_v18 }
 0x1e4   : > { %v1020_v21 = vmax.f32 %v1018_v19, 0.0 }
 0x1e5   : > { %v1021_v22 = vmax.f32 %v1019_v20, 0.0 }
 0x1e6   : > { %v1022_v23 = vpack.c.bf16 %v1020_v21, %v1020_v21 }
 0x1e7   : > { %v1023_v24 = vpack.c.bf16 %v1021_v22, %v1021_v22 }
 0x1e8   : > { %1164 = vmatmul.bf16.vlgmr.msra.gmra.mxu0 %v1022_v23 }
 0x1e9   : > { %1177 = vmatmul.bf16.vlgmr.msra.gmra.mxu1 %v1023_v24 }
 0x265   : > { %v1165_v52 = vpop.f32.mrf.mxu0 }
 0x266   : > { %v1166_v26 = vadd.f32 %v1513_v6, %v1165_v52  ;;  %v1178_v27 = vpop.f32.mrf.mxu1 }
 0x268   : > { %v1179_v29 = vadd.f32 %v1178_v27, %v1166_v26 }
 0x26a   : > { %1518 = vtanh.f32 %v1179_v29 }
 0x26d   : > { %v1167_v30 = vpop.f32.mrf.mxu0 }
 0x26e   : > { %v1180_v31 = vpop.f32.mrf.mxu1 }
 0x270   : > { %v1519_v32 = vpop.eup %1518 }
 0x271   : > { %1184 = vst.msk [vmem:[%s1859_s11] sm:$0xff] %vm1183_vm6, %v1519_v32 }
 0x272 PF: > { %s21_s17 = sadd.s32 1, %s1526_s17  }
 0x273   : > { %p18_p6 = scmp.ge.s32.totalorder %s21_s17, 4  }
 0x275   :  { %20 = sbr.rel (!%p18_p6) target bundleno = 1 (0x1), region = 99 }

</bundles_post_ra>
